<compile_context>
chip_gen: v5e
topology: v5e:2x2
jax: 0.10.0
libtpu: 0.0.40
codegen_flags: <defaults>
</compile_context>

<pallas_src>
import jax
import jax.numpy as jnp
from jax.experimental import pallas as pl
from jax.experimental.pallas import tpu as pltpu


# Stand-in for the PyTorch `constant.ANSWER_NUM_DICT` (small, deterministic).
ANSWER_NUM_DICT = {"open": 384, "wiki": 256, "kb": 128}


def _round_up(x, m):
    return ((x + m - 1) // m) * m


def _num_tensorcores():
    """Best-effort TensorCore count per chip (2 on v7x, 1 on v5e/v6e)."""
    try:
        kind = (jax.devices()[0].device_kind or "").lower()
        if "v7" in kind or "tpu7" in kind:
            return 2
    except Exception:
        pass
    return 1


# ---------------------------------------------------------------------------
# Kernels
# ---------------------------------------------------------------------------

def _dot_x_wt(x, w):
    # x: (tm, tk), w: (tn, tk)  ->  (tm, tn)
    # Contract the last dims of BOTH operands so the weight block is consumed
    # exactly as stored in HBM (no wrapper transpose, no extra HBM pass).
    return jax.lax.dot_general(
        x, w,
        dimension_numbers=(((1,), (1,)), ((), ())),
        preferred_element_type=jnp.float32,
    )


def _linear_kernel_single_k(x_ref, w_ref, o_ref):
    # Fast path: the whole K dimension fits in one block -> no accumulator,
    # no scratch, no epilogue copy.
    o_ref[...] = _dot_x_wt(x_ref[...], w_ref[...]).astype(o_ref.dtype)


def _linear_kernel_acc_out(x_ref, w_ref, o_ref):
    # Multi-K path, f32 output: accumulate directly into the resident output
    # block (saves the tm*tn*4 B scratch and the final copy).
    @pl.when(pl.program_id(2) == 0)
    def _():
        o_ref[...] = jnp.zeros_like(o_ref)

    o_ref[...] += _dot_x_wt(x_ref[...], w_ref[...])


def _linear_kernel_acc_scratch(x_ref, w_ref, o_ref, acc_ref):
    # Multi-K path, non-f32 output: keep an f32 accumulator, cast once at end.
    @pl.when(pl.program_id(2) == 0)
    def _():
        acc_ref[...] = jnp.zeros_like(acc_ref)

    acc_ref[...] += _dot_x_wt(x_ref[...], w_ref[...])

    @pl.when(pl.program_id(2) == pl.num_programs(2) - 1)
    def _():
        o_ref[...] = acc_ref[...].astype(o_ref.dtype)


# ---------------------------------------------------------------------------
# Tiling + pallas_call wrapper
# ---------------------------------------------------------------------------

def _choose_tn(n_out, n_cores):
    """Lane-dense N tile; split into >=2 blocks on multi-TC chips."""
    if n_out % 128 == 0:
        if n_cores > 1 and n_out >= 256:
            # Split the (parallel) N axis so megacore shards it across TCs.
            return max(128, min(512, _round_up(n_out // n_cores, 128)))
        return min(n_out, 512)
    # Ragged answer count: one (or a few) 128-multiple blocks; the boundary
    # output block is masked on store, extra weight rows are never stored.
    return min(_round_up(n_out, 128), 512)


def _pallas_linear_nobias(x, weight, n_out, out_dtype=jnp.float32):
    """logits = x @ weight[:n_out].T, without materializing the slice/transpose.

    x:      (M, K)
    weight: (N_full, K) with n_out <= N_full
    returns (M, n_out) in out_dtype (f32 accumulation on the MXU).
    """
    M, K = x.shape
    N_full, K2 = weight.shape
    assert K == K2 and n_out <= N_full, (x.shape, weight.shape, n_out)

    n_cores = _num_tensorcores()

    # Tile selection.
    tm = min(_round_up(M, 8), 256)              # fill the MXU M dim, sublane-aligned
    # K: take the full dim whenever reasonable (exempt from the 128 rule, and
    # avoids any K padding). Only split K when it is huge AND divides cleanly.
    tk = K if (K <= 2048 or K % 512 != 0) else 512
    # TODO(synk): for huge ragged K (> 2048, not a multiple of 512) this keeps
    # tk == K; add a zero-padded K path if such shapes ever appear.
    tn = _choose_tn(n_out, n_cores)

    grid_m = pl.cdiv(M, tm)
    grid_n = pl.cdiv(n_out, tn)
    grid_k = pl.cdiv(K, tk)                     # exact division by construction

    out_dtype = jnp.dtype(out_dtype)
    out_shape = jax.ShapeDtypeStruct((M, n_out), out_dtype)

    if grid_k == 1:
        kernel = _linear_kernel_single_k
        grid = (grid_m, grid_n)
        in_specs = [
            pl.BlockSpec((tm, tk), lambda i, j: (i, 0)),
            pl.BlockSpec((tn, tk), lambda i, j: (j, 0)),
        ]
        out_specs = pl.BlockSpec((tm, tn), lambda i, j: (i, j))
        scratch = []
        dims = ("parallel", "parallel")
    else:
        grid = (grid_m, grid_n, grid_k)
        in_specs = [
            pl.BlockSpec((tm, tk), lambda i, j, k: (i, k)),
            pl.BlockSpec((tn, tk), lambda i, j, k: (j, k)),
        ]
        out_specs = pl.BlockSpec((tm, tn), lambda i, j, k: (i, j))
        dims = ("parallel", "parallel", "arbitrary")
        if out_dtype == jnp.float32:
            kernel = _linear_kernel_acc_out
            scratch = []
        else:
            kernel = _linear_kernel_acc_scratch
            scratch = [pltpu.VMEM((tm, tn), jnp.float32)]

    # VMEM budget from the actual tile footprint (double-buffered inputs +
    # double-buffered output + optional scratch), with headroom. Floor 16 MiB,
    # cap 64 MiB so it is safe on v7x (64 MiB physical) and leaves room for
    # co-resident fusions on v5e/v6e (128 MiB physical).
    it_x = jnp.dtype(x.dtype).itemsize
    it_w = jnp.dtype(weight.dtype).itemsize
    it_o = out_dtype.itemsize
    tile_bytes = (2 * (tm * tk * it_x + tn * tk * it_w)
                  + 2 * tm * tn * it_o
                  + (tm * tn * 4 if scratch else 0))
    vmem_limit = int(min(64 * 1024 * 1024,
                         max(16 * 1024 * 1024, 2 * tile_bytes)))

    cost = pl.CostEstimate(
        flops=2 * M * K * n_out,
        transcendentals=0,
        bytes_accessed=(M * K * it_x + n_out * K * it_w + M * n_out * it_o),
    )

    return pl.pallas_call(
        kernel,
        out_shape=out_shape,
        grid_spec=pltpu.PrefetchScalarGridSpec(
            num_scalar_prefetch=0,
            grid=grid,
            in_specs=in_specs,
            out_specs=out_specs,
            scratch_shapes=scratch,
        ),
        compiler_params=pltpu.CompilerParams(
            dimension_semantics=dims,
            vmem_limit_bytes=vmem_limit,
        ),
        cost_estimate=cost,
    )(x, weight)


# ---------------------------------------------------------------------------
# Module-equivalent forward
# ---------------------------------------------------------------------------

def multi_rnn_output_to_logits(inputs, weight, output_type,
                               answer_num_dict=ANSWER_NUM_DICT):
    """Pallas implementation of MultiRNNoutput2Logits.forward.

    Args:
      inputs:  (..., output_dim) RNN outputs.
      weight:  (N_open, output_dim) nn.Linear weight (bias=False).
      output_type: one of 'open' | 'wiki' | 'kb' (static Python string).

    Returns:
      (..., answer_num_dict[output_type]) logits (same dtype as inputs,
      accumulated in f32 on the MXU).
    """
    if output_type not in answer_num_dict:
        raise ValueError("Decoder error: output type not one of the valid")
    n_out = answer_num_dict[output_type]

    lead, D = inputs.shape[:-1], inputs.shape[-1]
    x2d = inputs.reshape(-1, D)
    # The row restriction weight[:n_out] and the transpose are NOT materialized
    # here: the kernel grid only visits the first ceil(n_out/tn) weight row
    # blocks and contracts on the weight's last dim directly.
    logits = _pallas_linear_nobias(x2d, weight, n_out, out_dtype=inputs.dtype)
    return logits.reshape(*lead, n_out)


def _reference(inputs, weight, output_type, answer_num_dict=ANSWER_NUM_DICT):
    n_out = answer_num_dict[output_type]
    return jnp.dot(inputs, weight[:n_out, :].T,
                   preferred_element_type=jnp.float32).astype(inputs.dtype)


if __name__ == "__main__":
    # Small shapes consistent with the module: output_dim=64 RNN features,
    # answer sets open/wiki/kb = 384/256/128.
    B, D = 16, 64

    key = jax.random.PRNGKey(0)
    k_x, k_w, k_x3 = jax.random.split(key, 3)
    inputs = jax.random.normal(k_x, (B, D), dtype=jnp.float32)
    inputs3d = jax.random.normal(k_x3, (2, 8, D), dtype=jnp.float32)
    weight = jax.random.normal(
        k_w, (ANSWER_NUM_DICT["open"], D), dtype=jnp.float32) * 0.05

    ok = True
    for output_type in ("open", "wiki", "kb"):
        # 2-D batch.
        logits = multi_rnn_output_to_logits(inputs, weight, output_type)
        jax.block_until_ready(logits)
        ref = _reference(inputs, weight, output_type)
        ok &= logits.shape == (B, ANSWER_NUM_DICT[output_type])
        ok &= bool(jnp.allclose(logits, ref, atol=1e-3, rtol=1e-3))

        # Batched leading dims (flattened internally).
        logits3 = multi_rnn_output_to_logits(inputs3d, weight, output_type)
        jax.block_until_ready(logits3)
        ref3 = _reference(inputs3d, weight, output_type)
        ok &= logits3.shape == (2, 8, ANSWER_NUM_DICT[output_type])
        ok &= bool(jnp.allclose(logits3, ref3, atol=1e-3, rtol=1e-3))

    # The invalid-type branch raises, matching the PyTorch module.
    try:
        multi_rnn_output_to_logits(inputs, weight, "bogus")
        ok = False
    except ValueError:
        pass

    assert ok
    print("KERNEL_OK")
</pallas_src>

<mosaic_0001>
module attributes {stable_mosaic.version = 11 : i64} {
  func.func @_linear_kernel_single_k(%arg0: i32, %arg1: i32, %arg2: memref<16x64xf32, #tpu.memory_space<vmem>>, %arg3: memref<384x64xf32, #tpu.memory_space<vmem>>, %arg4: memref<16x384xf32, #tpu.memory_space<vmem>>) attributes {dimension_semantics = [#tpu.dimension_semantics<parallel>, #tpu.dimension_semantics<parallel>], iteration_bounds = array<i64: 1, 1>, scalar_prefetch = 0 : i64, scratch_operands = 0 : i64, tpu.core_type = #tpu.core_type<tc>, window_params = [{transform_indices = @transform_0, window_bounds = array<i64: 16, 64>}, {transform_indices = @transform_1, window_bounds = array<i64: 384, 64>}, {transform_indices = @transform_2, window_bounds = array<i64: 16, 384>}]} {
    %c0 = arith.constant 0 : index
    %c0_0 = arith.constant 0 : index
    %0 = vector.load %arg2[%c0, %c0_0] : memref<16x64xf32, #tpu.memory_space<vmem>>, vector<16x64xf32>
    %c0_1 = arith.constant 0 : index
    %c0_2 = arith.constant 0 : index
    %1 = vector.load %arg3[%c0_1, %c0_2] : memref<384x64xf32, #tpu.memory_space<vmem>>, vector<384x64xf32>
    %cst = arith.constant dense<0.000000e+00> : vector<16x384xf32>
    %2 = tpu.matmul %0, %1, %cst {dimension_numbers = #tpu.dot_dimension_numbers<[1], [1], [0], [0], [0, 0, 1, 0], [], []>} : vector<16x64xf32>, vector<384x64xf32>, vector<16x384xf32> -> vector<16x384xf32>
    %c0_3 = arith.constant 0 : index
    %c0_4 = arith.constant 0 : index
    %3 = vector.load %arg4[%c0_3, %c0_4] : memref<16x384xf32, #tpu.memory_space<vmem>>, vector<16x384xf32>
    tpu.vector_store %arg4[%c0_3, %c0_4], %2 {strides = array<i32>} : memref<16x384xf32, #tpu.memory_space<vmem>>, vector<16x384xf32>,
    return
  }
  func.func @transform_0(%arg0: i32, %arg1: i32) -> (i32, i32) {
    %c0_i32 = arith.constant 0 : i32
    %c0_i32_0 = arith.constant 0 : i32
    return %arg0, %c0_i32 : i32, i32
  }
  func.func @transform_1(%arg0: i32, %arg1: i32) -> (i32, i32) {
    %c0_i32 = arith.constant 0 : i32
    %c0_i32_0 = arith.constant 0 : i32
    return %arg1, %c0_i32 : i32, i32
  }
  func.func @transform_2(%arg0: i32, %arg1: i32) -> (i32, i32) {
    %c0_i32 = arith.constant 0 : i32
    return %arg0, %arg1 : i32, i32
  }
}

</mosaic_0001>

<bundles_post_ra>
// kernel: tpu_custom_call.1
= control target key start
LH: loop header
LB: loop body
LE: loop exit
PB: predicated region body
PF: predicated region fallthrough
CT: control target
= control target key end

     0   :  { %vm62_vm0 = vcmask 523264   ;;  %s646_s0 = inlined_call_operand.vmem [shape: f32[16,64], index: 0, kind: input, shape index: {}]   ;;  %s647_s1 = inlined_call_operand.vmem [shape: f32[384,64], index: 1, kind: input, shape index: {}]   ;;  %s648_s2 = inlined_call_operand.hbm [shape: f32[16,384], index: 2, kind: output, shape index: {}]  }
   0x1   :  { %v61_v0 = vld [vmem:[%s647_s1 + $0x178] sm:$0xff]  ;;  %v60_v3 = vld [vmem:[%s647_s1 + $0x170] sm:$0xff]  ;;  %v59_v6 = vld [vmem:[%s647_s1 + $0x168] sm:$0xff] }
   0x2   :  { %v45_v1 = vld [vmem:[%s647_s1 + $0xf8] sm:$0xff]  ;;  %342 = vmatpush.xpose.msk.msra.mxu2 %vm62_vm0, %v61_v0  ;;  %v44_v4 = vld [vmem:[%s647_s1 + $0xf0] sm:$0xff]  ;;  %v43_v7 = vld [vmem:[%s647_s1 + $0xe8] sm:$0xff] }
   0x3   :  { %324 = vmatpush.xpose.msk.msra.mxu1 %vm62_vm0, %v45_v1  ;;  %v29_v2 = vld [vmem:[%s647_s1 + $0x78] sm:$0xff]  ;;  %v28_v5 = vld [vmem:[%s647_s1 + $0x70] sm:$0xff]  ;;  %v27_v8 = vld [vmem:[%s647_s1 + $0x68] sm:$0xff] }
   0x4   :  { %360 = vmatpush.xpose.msk.msra.mxu3 %vm62_vm0, %v29_v2  ;;  %306 = vmatpush.xpose.msk.msra.mxu0 %vm62_vm0, %v29_v2  ;;  %v58_v9 = vld [vmem:[%s647_s1 + $0x160] sm:$0xff] }
   0x5   :  { %v42_v10 = vld [vmem:[%s647_s1 + $0xe0] sm:$0xff] }
   0x6   :  { %343 = vmatpush.xpose.msk.msra.mxu2 %vm62_vm0, %v60_v3 }
   0x7   :  { %325 = vmatpush.xpose.msk.msra.mxu1 %vm62_vm0, %v44_v4 }
   0x8   :  { %361 = vmatpush.xpose.msk.msra.mxu3 %vm62_vm0, %v28_v5  ;;  %307 = vmatpush.xpose.msk.msra.mxu0 %vm62_vm0, %v28_v5 }
   0xa   :  { %344 = vmatpush.xpose.msk.msra.mxu2 %vm62_vm0, %v59_v6 }
   0xb   :  { %326 = vmatpush.xpose.msk.msra.mxu1 %vm62_vm0, %v43_v7 }
   0xc   :  { %362 = vmatpush.xpose.msk.msra.mxu3 %vm62_vm0, %v27_v8  ;;  %308 = vmatpush.xpose.msk.msra.mxu0 %vm62_vm0, %v27_v8 }
   0xd   :  { %7 = vsyncpa [#allocation3], 0  ;;  %v26_v11 = vld [vmem:[%s647_s1 + $0x60] sm:$0xff]  ;;  %v57_v12 = vld [vmem:[%s647_s1 + $0x158] sm:$0xff]  ;;  %s294_s27 = sshll.u32 %s648_s2, 4  ;;  %s406_s28 = smov 384   ;;  %s295_s27 = int_to_ptr.hbm [resolvable:$true] %s294_s27 }
   0xe   :  { %345 = vmatpush.xpose.msk.msra.mxu2 %vm62_vm0, %v58_v9  ;;  %v41_v13 = vld [vmem:[%s647_s1 + $0xd8] sm:$0xff]  ;;  %v56_v15 = vld [vmem:[%s647_s1 + $0x150] sm:$0xff]  ;;  %v55_v18 = vld [vmem:[%s647_s1 + $0x148] sm:$0xff]  ;;  %s407_s29 = smov 24  }
   0xf   :  { %327 = vmatpush.xpose.msk.msra.mxu1 %vm62_vm0, %v42_v10  ;;  %v25_v14 = vld [vmem:[%s647_s1 + $0x58] sm:$0xff]  ;;  %v40_v16 = vld [vmem:[%s647_s1 + $0xd0] sm:$0xff]  ;;  %v39_v19 = vld [vmem:[%s647_s1 + $0xc8] sm:$0xff] }
  0x10   :  { %363 = vmatpush.xpose.msk.msra.mxu3 %vm62_vm0, %v26_v11  ;;  %309 = vmatpush.xpose.msk.msra.mxu0 %vm62_vm0, %v26_v11  ;;  %v24_v17 = vld [vmem:[%s647_s1 + $0x50] sm:$0xff]  ;;  %v23_v20 = vld [vmem:[%s647_s1 + $0x48] sm:$0xff]  ;;  %v54_v21 = vld [vmem:[%s647_s1 + $0x140] sm:$0xff] }
  0x11   :  { %v38_v22 = vld [vmem:[%s647_s1 + $0xc0] sm:$0xff]  ;;  %v53_v24 = vld [vmem:[%s647_s1 + $0x138] sm:$0xff]  ;;  %v52_v27 = vld [vmem:[%s647_s1 + $0x130] sm:$0xff] }
  0x12   :  { %346 = vmatpush.xpose.msk.msra.mxu2 %vm62_vm0, %v57_v12  ;;  %v22_v23 = vld [vmem:[%s647_s1 + $0x40] sm:$0xff]  ;;  %v37_v25 = vld [vmem:[%s647_s1 + $0xb8] sm:$0xff]  ;;  %v36_v28 = vld [vmem:[%s647_s1 + $0xb0] sm:$0xff] }
  0x13   :  { %328 = vmatpush.xpose.msk.msra.mxu1 %vm62_vm0, %v41_v13  ;;  %v21_v26 = vld [vmem:[%s647_s1 + $0x38] sm:$0xff]  ;;  %v20_v29 = vld [vmem:[%s647_s1 + $0x30] sm:$0xff]  ;;  %v51_v30 = vld [vmem:[%s647_s1 + $0x128] sm:$0xff] }
  0x14   :  { %364 = vmatpush.xpose.msk.msra.mxu3 %vm62_vm0, %v25_v14  ;;  %310 = vmatpush.xpose.msk.msra.mxu0 %vm62_vm0, %v25_v14  ;;  %v35_v31 = vld [vmem:[%s647_s1 + $0xa8] sm:$0xff]  ;;  %v50_v33 = vld [vmem:[%s647_s1 + $0x120] sm:$0xff]  ;;  %v49_v36 = vld [vmem:[%s647_s1 + $0x118] sm:$0xff] }
  0x15   :  { %v19_v32 = vld [vmem:[%s647_s1 + $0x28] sm:$0xff]  ;;  %v34_v34 = vld [vmem:[%s647_s1 + $0xa0] sm:$0xff]  ;;  %v33_v37 = vld [vmem:[%s647_s1 + $0x98] sm:$0xff] }
  0x16   :  { %347 = vmatpush.xpose.msk.msra.mxu2 %vm62_vm0, %v56_v15  ;;  %v18_v35 = vld [vmem:[%s647_s1 + $0x20] sm:$0xff]  ;;  %v17_v38 = vld [vmem:[%s647_s1 + $0x18] sm:$0xff]  ;;  %v48_v39 = vld [vmem:[%s647_s1 + $0x110] sm:$0xff] }
  0x17   :  { %329 = vmatpush.xpose.msk.msra.mxu1 %vm62_vm0, %v40_v16  ;;  %v32_v40 = vld [vmem:[%s647_s1 + $0x90] sm:$0xff]  ;;  %v47_v42 = vld [vmem:[%s647_s1 + $0x108] sm:$0xff]  ;;  %v46_v45 = vld [vmem:[%s647_s1 + $0x100] sm:$0xff] }
  0x18   :  { %365 = vmatpush.xpose.msk.msra.mxu3 %vm62_vm0, %v24_v17  ;;  %311 = vmatpush.xpose.msk.msra.mxu0 %vm62_vm0, %v24_v17  ;;  %v16_v41 = vld [vmem:[%s647_s1 + $0x10] sm:$0xff]  ;;  %v31_v43 = vld [vmem:[%s647_s1 + $0x88] sm:$0xff]  ;;  %v30_v46 = vld [vmem:[%s647_s1 + $0x80] sm:$0xff] }
  0x19   :  { %v15_v44 = vld [vmem:[%s647_s1 + $0x8] sm:$0xff]  ;;  %v14_v47 = vld [vmem:[%s647_s1] sm:$0xff] }
  0x1a   :  { %348 = vmatpush.xpose.msk.msra.mxu2 %vm62_vm0, %v55_v18  ;;  %v12_v48 = vld [vmem:[%s646_s0] sm:$0xff]  ;;  %v13_v49 = vld [vmem:[%s646_s0 + $0x8] sm:$0xff]  ;;  %s405_s0 = smov [#allocation2]  }
  0x1b   :  { %330 = vmatpush.xpose.msk.msra.mxu1 %vm62_vm0, %v39_v19  ;;  %s292_s1 = sshll.u32 %s405_s0, 4  ;;  %s293_s1 = int_to_ptr.vmem [resolvable:$true] %s292_s1 }
  0x1c   :  { %366 = vmatpush.xpose.msk.msra.mxu3 %vm62_vm0, %v23_v20  ;;  %312 = vmatpush.xpose.msk.msra.mxu0 %vm62_vm0, %v23_v20 }
  0x1e   :  { %349 = vmatpush.xpose.msk.msra.mxu2 %vm62_vm0, %v54_v21 }
  0x1f   :  { %331 = vmatpush.xpose.msk.msra.mxu1 %vm62_vm0, %v38_v22 }
  0x20   :  { %367 = vmatpush.xpose.msk.msra.mxu3 %vm62_vm0, %v22_v23  ;;  %313 = vmatpush.xpose.msk.msra.mxu0 %vm62_vm0, %v22_v23 }
  0x22   :  { %350 = vmatpush.xpose.msk.msra.mxu2 %vm62_vm0, %v53_v24 }
  0x23   :  { %332 = vmatpush.xpose.msk.msra.mxu1 %vm62_vm0, %v37_v25 }
  0x24   :  { %368 = vmatpush.xpose.msk.msra.mxu3 %vm62_vm0, %v21_v26  ;;  %314 = vmatpush.xpose.msk.msra.mxu0 %vm62_vm0, %v21_v26 }
  0x26   :  { %351 = vmatpush.xpose.msk.msra.mxu2 %vm62_vm0, %v52_v27 }
  0x27   :  { %333 = vmatpush.xpose.msk.msra.mxu1 %vm62_vm0, %v36_v28 }
  0x28   :  { %369 = vmatpush.xpose.msk.msra.mxu3 %vm62_vm0, %v20_v29  ;;  %315 = vmatpush.xpose.msk.msra.mxu0 %vm62_vm0, %v20_v29 }
  0x2a   :  { %352 = vmatpush.xpose.msk.msra.mxu2 %vm62_vm0, %v51_v30 }
  0x2b   :  { %334 = vmatpush.xpose.msk.msra.mxu1 %vm62_vm0, %v35_v31 }
  0x2c   :  { %370 = vmatpush.xpose.msk.msra.mxu3 %vm62_vm0, %v19_v32  ;;  %316 = vmatpush.xpose.msk.msra.mxu0 %vm62_vm0, %v19_v32 }
  0x2e   :  { %353 = vmatpush.xpose.msk.msra.mxu2 %vm62_vm0, %v50_v33 }
  0x2f   :  { %335 = vmatpush.xpose.msk.msra.mxu1 %vm62_vm0, %v34_v34 }
  0x30   :  { %371 = vmatpush.xpose.msk.msra.mxu3 %vm62_vm0, %v18_v35  ;;  %317 = vmatpush.xpose.msk.msra.mxu0 %vm62_vm0, %v18_v35 }
  0x32   :  { %354 = vmatpush.xpose.msk.msra.mxu2 %vm62_vm0, %v49_v36 }
  0x33   :  { %336 = vmatpush.xpose.msk.msra.mxu1 %vm62_vm0, %v33_v37 }
  0x34   :  { %372 = vmatpush.xpose.msk.msra.mxu3 %vm62_vm0, %v17_v38  ;;  %318 = vmatpush.xpose.msk.msra.mxu0 %vm62_vm0, %v17_v38 }
  0x36   :  { %355 = vmatpush.xpose.msk.msra.mxu2 %vm62_vm0, %v48_v39 }
  0x37   :  { %337 = vmatpush.xpose.msk.msra.mxu1 %vm62_vm0, %v32_v40 }
  0x38   :  { %373 = vmatpush.xpose.msk.msra.mxu3 %vm62_vm0, %v16_v41  ;;  %319 = vmatpush.xpose.msk.msra.mxu0 %vm62_vm0, %v16_v41 }
  0x3a   :  { %356 = vmatpush.xpose.msk.msra.mxu2 %vm62_vm0, %v47_v42 }
  0x3b   :  { %338 = vmatpush.xpose.msk.msra.mxu1 %vm62_vm0, %v31_v43 }
  0x3c   :  { %374 = vmatpush.xpose.msk.msra.mxu3 %vm62_vm0, %v15_v44  ;;  %320 = vmatpush.xpose.msk.msra.mxu0 %vm62_vm0, %v15_v44 }
  0x3e   :  { %357 = vmatpush.xpose.msk.msra.mxu2 %vm62_vm0, %v46_v45 }
  0x3f   :  { %339 = vmatpush.xpose.msk.msra.mxu1 %vm62_vm0, %v30_v46 }
  0x40   :  { %375 = vmatpush.xpose.msk.msra.mxu3 %vm62_vm0, %v14_v47  ;;  %321 = vmatpush.xpose.msk.msra.mxu0 %vm62_vm0, %v14_v47 }
  0x41   :  { %358 = vmatmul.msk.f32.vlgmr.msra.gmra.mxu2 %vm62_vm0, %v12_v48 }
  0x42   :  { %340 = vmatmul.msk.f32.vlgmr.msra.gmra.mxu1 %vm62_vm0, %v12_v48 }
  0x43   :  { %323 = vmatmul.msk.f32.vlgmr.msra.gmra.mxu3 %vm62_vm0, %v13_v49  ;;  %322 = vmatmul.msk.f32.vlgmr.msra.gmra.mxu0 %vm62_vm0, %v12_v48 }
  0x49   :  { %359 = vmatmul.msk.f32.gmra.mxu2 %vm62_vm0, %v13_v49 }
  0x4a   :  { %341 = vmatmul.msk.f32.gmra.mxu1 %vm62_vm0, %v13_v49 }
  0xbf   :  { %v253_v50 = vpop.f32.mrf.mxu1 }
  0xc0   :  { %283 = vst [vmem:[#allocation2 + $0x8] sm:$0xff] %v253_v50  ;;  %v230_v51 = vpop.f32.mrf.mxu0 }
  0xc1   :  { %282 = vst [vmem:[#allocation2] sm:$0xff] %v230_v51 }
  0xc4   :  { %v276_v52 = vpop.f32.mrf.mxu2 }
  0xc5   :  { %284 = vst [vmem:[#allocation2 + $0x10] sm:$0xff] %v276_v52 }
  0xc6   :  { %v233_v53 = vpop.f32.mrf.mxu3 }
  0xc7   :  { %285 = vst [vmem:[#allocation2 + $0x18] sm:$0xff] %v233_v53  ;;  %v256_v54 = vpop.f32.mrf.mxu1 }
  0xc8   :  { %286 = vst [vmem:[#allocation2 + $0x20] sm:$0xff] %v256_v54 }
  0xcc   :  { %v279_v55 = vpop.f32.mrf.mxu2 }
  0xcd   :  { %287 = vst [vmem:[#allocation2 + $0x28] sm:$0xff] %v279_v55 }
  0xce   :  { %300 = dma.vmem_to_hbm [thread:$0]  %s293_s1, 768, %s295_s27, [#allocation3], %s406_s28, %s406_s28, %s407_s29  }
  0xcf   :  { %403 = dma.done.wait [#allocation3], 768  }
  0xd0   :  { %404 = vsyncadd [#allocation3], 4294966528 }
  0xd1   :  { %305 = vsyncpa [#allocation3], 1 }

</bundles_post_ra>
